<compile_context>
chip_gen: v7x
topology: tpu7x:2x2x1
jax: 0.10.0
libtpu: 0.0.40
codegen_flags: <defaults>
</compile_context>

<pallas_src>
import functools

import jax
import jax.numpy as jnp
from jax.experimental import pallas as pl
from jax.experimental.pallas import tpu as pltpu


def _dilated_circular_conv_kernel(x_ref, w_ref, b_ref, o_ref, xcol_ref, *,
                                  n_out, ksize, dilation, pad, c_in, c_out,
                                  bt):
    """One grid step = `bt` batch elements.

    x_ref    : (bt, C_in, N)         un-padded input (NCL layout)
    w_ref    : (C_out_pad, K*C_in)   im2col weight, tap-major columns
    b_ref    : (C_out, 1)            bias
    o_ref    : (bt, C_out, N)        output
    xcol_ref : (bt, K*C_in, N)       VMEM scratch: im2col matrix
    """
    # --- 1. Build the im2col matrix directly in VMEM.  The circular pad is
    #        realized here: tap k reads the input circularly shifted by
    #        s = k*dilation - pad, i.e. (at most) two contiguous slices of the
    #        un-padded block.  All static-offset ref loads/stores, no value
    #        concatenates, no XLU work, no padded copy in HBM.
    for k in range(ksize):
        s = k * dilation - pad            # |s| <= pad <= N by construction
        r0 = k * c_in
        if s == 0:
            xcol_ref[:, r0:r0 + c_in, :] = x_ref[...]
        elif s > 0:
            xcol_ref[:, r0:r0 + c_in, 0:n_out - s] = x_ref[:, :, s:n_out]
            xcol_ref[:, r0:r0 + c_in, n_out - s:n_out] = x_ref[:, :, 0:s]
        else:  # s < 0
            xcol_ref[:, r0:r0 + c_in, 0:-s] = x_ref[:, :, n_out + s:n_out]
            xcol_ref[:, r0:r0 + c_in, -s:n_out] = x_ref[:, :, 0:n_out + s]

    # --- 2. One MXU pass per batch element (contraction depth K*C_in), then
    #        bias add on the VPU and a single store of the valid C_out rows.
    bias = b_ref[...]                                    # (C_out, 1)
    for b in range(bt):
        y = jnp.dot(w_ref[...], xcol_ref[b],
                    preferred_element_type=jnp.float32)  # (C_out_pad, N)
        o_ref[b] = (y[0:c_out, :] + bias).astype(o_ref.dtype)


def dilated_circular_conv(x_ncl, weight, bias, *, n_adj, dilation):
    """x_ncl: (B, C_in, N).  weight: (C_out, C_in, K) as in nn.Conv1d.  bias: (C_out,)."""
    B, C_in, N = x_ncl.shape
    C_out, C_in_w, K = weight.shape
    assert C_in_w == C_in
    assert K == 2 * n_adj + 1

    pad = n_adj * dilation
    # Matches PyTorch's own restriction for the circular-pad-by-cat trick.
    assert pad <= N, f"circular pad {pad} exceeds sequence length {N}"

    # im2col weight: w_col[o, k*C_in + c] = weight[o, c, k]; rows zero-padded
    # to a sublane multiple so the matmul output tile is sublane-aligned.
    C_out_pad = ((C_out + 7) // 8) * 8
    w_col = jnp.transpose(weight, (0, 2, 1)).reshape(C_out, K * C_in)
    if C_out_pad > C_out:
        w_col = jnp.pad(w_col, ((0, C_out_pad - C_out), (0, 0)))
    b_2d = bias.reshape(C_out, 1)

    # Batch-tile choice: pack enough batch elements per step to amortize the
    # per-step overhead (target ~512 output lanes), but keep >=2 grid steps
    # whenever B >= 2 so both v7x TensorCores get work and the software
    # pipeline can overlap prefetch with compute.
    target = max(1, 512 // max(N, 1))
    bt = min(B, target)
    while B % bt != 0:
        bt -= 1
    if B // bt < 2 and B >= 2:
        bt = max(1, bt // 2)
        while B % bt != 0:
            bt -= 1

    kernel = functools.partial(
        _dilated_circular_conv_kernel, n_out=N, ksize=K, dilation=dilation,
        pad=pad, c_in=C_in, c_out=C_out, bt=bt)

    out = pl.pallas_call(
        kernel,
        out_shape=jax.ShapeDtypeStruct((B, C_out, N), x_ncl.dtype),
        grid_spec=pltpu.PrefetchScalarGridSpec(
            num_scalar_prefetch=0,
            grid=(B // bt,),
            in_specs=[
                pl.BlockSpec((bt, C_in, N), lambda i: (i, 0, 0)),
                pl.BlockSpec((C_out_pad, K * C_in), lambda i: (0, 0)),
                pl.BlockSpec((C_out, 1), lambda i: (0, 0)),
            ],
            out_specs=pl.BlockSpec((bt, C_out, N), lambda i: (i, 0, 0)),
            scratch_shapes=[pltpu.VMEM((bt, K * C_in, N), x_ncl.dtype)],
        ),
        compiler_params=pltpu.CompilerParams(
            dimension_semantics=("parallel",),
            vmem_limit_bytes=32 * 1024 * 1024),
    )(x_ncl, w_col, b_2d)

    return out  # PyTorch NCL layout


def _reference(x_ncl, weight, bias, *, n_adj, dilation):
    """Pure-JAX reference matching torch.nn.Conv1d on the circularly padded input."""
    pad = n_adj * dilation
    if n_adj != 0:
        x_ncl = jnp.concatenate(
            [x_ncl[..., -pad:], x_ncl, x_ncl[..., :pad]], axis=2)
    out = jax.lax.conv_general_dilated(
        x_ncl, weight,
        window_strides=(1,), padding="VALID",
        rhs_dilation=(dilation,),
        dimension_numbers=("NCH", "OIH", "NCH"))
    return out + bias[None, :, None]


if __name__ == "__main__":
    # Module config (DilatedCircularConv defaults, plus one dilated variant).
    state_dim = 4          # C_in
    out_state_dim = 4      # C_out
    B, N = 2, 16           # batch, number of contour points

    key = jax.random.PRNGKey(0)
    for (n_adj, dilation) in [(4, 1), (4, 2)]:
        ksize = 2 * n_adj + 1
        kx, kw, kb, key = jax.random.split(key, 4)
        x = jax.random.normal(kx, (B, state_dim, N), dtype=jnp.float32)
        # Deterministic synthetic Conv1d parameters (shape per nn.Conv1d).
        weight = jax.random.normal(
            kw, (out_state_dim, state_dim, ksize), dtype=jnp.float32) * 0.1
        bias = jax.random.normal(kb, (out_state_dim,), dtype=jnp.float32) * 0.1

        out = dilated_circular_conv(
            x, weight, bias, n_adj=n_adj, dilation=dilation)
        out = jax.block_until_ready(out)

        ref = _reference(x, weight, bias, n_adj=n_adj, dilation=dilation)
        assert out.shape == (B, out_state_dim, N), out.shape
        assert jnp.allclose(out, ref, atol=1e-4, rtol=1e-4), (
            float(jnp.max(jnp.abs(out - ref))))

    print("KERNEL_OK")
</pallas_src>

<mosaic_0001>
module attributes {stable_mosaic.version = 11 : i64} {
  func.func @_dilated_circular_conv_kernel(%arg0: i32, %arg1: memref<1x4x16xf32, #tpu.memory_space<vmem>>, %arg2: memref<8x36xf32, #tpu.memory_space<vmem>>, %arg3: memref<4x1xf32, #tpu.memory_space<vmem>>, %arg4: memref<1x4x16xf32, #tpu.memory_space<vmem>>, %arg5: memref<1x36x16xf32, #tpu.memory_space<vmem>>) attributes {dimension_semantics = [#tpu.dimension_semantics<parallel>], iteration_bounds = array<i64: 2>, scalar_prefetch = 0 : i64, scratch_operands = 1 : i64, tpu.core_type = #tpu.core_type<tc>, window_params = [{transform_indices = @transform_0, window_bounds = array<i64: 1, 4, 16>}, {pipeline_mode = #tpu.pipeline_mode<synchronous>, transform_indices = @transform_1, window_bounds = array<i64: 8, 36>}, {pipeline_mode = #tpu.pipeline_mode<synchronous>, transform_indices = @transform_2, window_bounds = array<i64: 4, 1>}, {transform_indices = @transform_3, window_bounds = array<i64: 1, 4, 16>}]} {
    %c0 = arith.constant 0 : index
    %c0_0 = arith.constant 0 : index
    %c12 = arith.constant 12 : index
    %0 = vector.load %arg1[%c0, %c0_0, %c12] : memref<1x4x16xf32, #tpu.memory_space<vmem>>, vector<1x4x4xf32>
    %c0_1 = arith.constant 0 : index
    %c0_2 = arith.constant 0 : index
    %c0_3 = arith.constant 0 : index
    %1 = vector.load %arg5[%c0_1, %c0_2, %c0_3] : memref<1x36x16xf32, #tpu.memory_space<vmem>>, vector<1x4x4xf32>
    tpu.vector_store %arg5[%c0_1, %c0_2, %c0_3], %0 {strides = array<i32>} : memref<1x36x16xf32, #tpu.memory_space<vmem>>, vector<1x4x4xf32>,
    %c0_4 = arith.constant 0 : index
    %c0_5 = arith.constant 0 : index
    %c0_6 = arith.constant 0 : index
    %2 = vector.load %arg1[%c0_4, %c0_5, %c0_6] : memref<1x4x16xf32, #tpu.memory_space<vmem>>, vector<1x4x12xf32>
    %c0_7 = arith.constant 0 : index
    %c0_8 = arith.constant 0 : index
    %c4 = arith.constant 4 : index
    %3 = vector.load %arg5[%c0_7, %c0_8, %c4] : memref<1x36x16xf32, #tpu.memory_space<vmem>>, vector<1x4x12xf32>
    tpu.vector_store %arg5[%c0_7, %c0_8, %c4], %2 {strides = array<i32>} : memref<1x36x16xf32, #tpu.memory_space<vmem>>, vector<1x4x12xf32>,
    %c0_9 = arith.constant 0 : index
    %c0_10 = arith.constant 0 : index
    %c13 = arith.constant 13 : index
    %4 = vector.load %arg1[%c0_9, %c0_10, %c13] : memref<1x4x16xf32, #tpu.memory_space<vmem>>, vector<1x4x3xf32>
    %c0_11 = arith.constant 0 : index
    %c4_12 = arith.constant 4 : index
    %c0_13 = arith.constant 0 : index
    %5 = vector.load %arg5[%c0_11, %c4_12, %c0_13] : memref<1x36x16xf32, #tpu.memory_space<vmem>>, vector<1x4x3xf32>
    tpu.vector_store %arg5[%c0_11, %c4_12, %c0_13], %4 {strides = array<i32>} : memref<1x36x16xf32, #tpu.memory_space<vmem>>, vector<1x4x3xf32>,
    %c0_14 = arith.constant 0 : index
    %c0_15 = arith.constant 0 : index
    %c0_16 = arith.constant 0 : index
    %6 = vector.load %arg1[%c0_14, %c0_15, %c0_16] : memref<1x4x16xf32, #tpu.memory_space<vmem>>, vector<1x4x13xf32>
    %c0_17 = arith.constant 0 : index
    %c4_18 = arith.constant 4 : index
    %c3 = arith.constant 3 : index
    %7 = vector.load %arg5[%c0_17, %c4_18, %c3] : memref<1x36x16xf32, #tpu.memory_space<vmem>>, vector<1x4x13xf32>
    tpu.vector_store %arg5[%c0_17, %c4_18, %c3], %6 {strides = array<i32>} : memref<1x36x16xf32, #tpu.memory_space<vmem>>, vector<1x4x13xf32>,
    %c0_19 = arith.constant 0 : index
    %c0_20 = arith.constant 0 : index
    %c14 = arith.constant 14 : index
    %8 = vector.load %arg1[%c0_19, %c0_20, %c14] : memref<1x4x16xf32, #tpu.memory_space<vmem>>, vector<1x4x2xf32>
    %c0_21 = arith.constant 0 : index
    %c8 = arith.constant 8 : index
    %c0_22 = arith.constant 0 : index
    %9 = vector.load %arg5[%c0_21, %c8, %c0_22] : memref<1x36x16xf32, #tpu.memory_space<vmem>>, vector<1x4x2xf32>
    tpu.vector_store %arg5[%c0_21, %c8, %c0_22], %8 {strides = array<i32>} : memref<1x36x16xf32, #tpu.memory_space<vmem>>, vector<1x4x2xf32>,
    %c0_23 = arith.constant 0 : index
    %c0_24 = arith.constant 0 : index
    %c0_25 = arith.constant 0 : index
    %10 = vector.load %arg1[%c0_23, %c0_24, %c0_25] : memref<1x4x16xf32, #tpu.memory_space<vmem>>, vector<1x4x14xf32>
    %c0_26 = arith.constant 0 : index
    %c8_27 = arith.constant 8 : index
    %c2 = arith.constant 2 : index
    %11 = vector.load %arg5[%c0_26, %c8_27, %c2] : memref<1x36x16xf32, #tpu.memory_space<vmem>>, vector<1x4x14xf32>
    tpu.vector_store %arg5[%c0_26, %c8_27, %c2], %10 {strides = array<i32>} : memref<1x36x16xf32, #tpu.memory_space<vmem>>, vector<1x4x14xf32>,
    %c0_28 = arith.constant 0 : index
    %c0_29 = arith.constant 0 : index
    %c15 = arith.constant 15 : index
    %12 = vector.load %arg1[%c0_28, %c0_29, %c15] : memref<1x4x16xf32, #tpu.memory_space<vmem>>, vector<1x4x1xf32>
    %c0_30 = arith.constant 0 : index
    %c12_31 = arith.constant 12 : index
    %c0_32 = arith.constant 0 : index
    %13 = vector.load %arg5[%c0_30, %c12_31, %c0_32] : memref<1x36x16xf32, #tpu.memory_space<vmem>>, vector<1x4x1xf32>
    tpu.vector_store %arg5[%c0_30, %c12_31, %c0_32], %12 {strides = array<i32>} : memref<1x36x16xf32, #tpu.memory_space<vmem>>, vector<1x4x1xf32>,
    %c0_33 = arith.constant 0 : index
    %c0_34 = arith.constant 0 : index
    %c0_35 = arith.constant 0 : index
    %14 = vector.load %arg1[%c0_33, %c0_34, %c0_35] : memref<1x4x16xf32, #tpu.memory_space<vmem>>, vector<1x4x15xf32>
    %c0_36 = arith.constant 0 : index
    %c12_37 = arith.constant 12 : index
    %c1 = arith.constant 1 : index
    %15 = vector.load %arg5[%c0_36, %c12_37, %c1] : memref<1x36x16xf32, #tpu.memory_space<vmem>>, vector<1x4x15xf32>
    tpu.vector_store %arg5[%c0_36, %c12_37, %c1], %14 {strides = array<i32>} : memref<1x36x16xf32, #tpu.memory_space<vmem>>, vector<1x4x15xf32>,
    %c0_38 = arith.constant 0 : index
    %c0_39 = arith.constant 0 : index
    %c0_40 = arith.constant 0 : index
    %16 = vector.load %arg1[%c0_38, %c0_39, %c0_40] : memref<1x4x16xf32, #tpu.memory_space<vmem>>, vector<1x4x16xf32>
    %c0_41 = arith.constant 0 : index
    %c16 = arith.constant 16 : index
    %c0_42 = arith.constant 0 : index
    %17 = vector.load %arg5[%c0_41, %c16, %c0_42] : memref<1x36x16xf32, #tpu.memory_space<vmem>>, vector<1x4x16xf32>
    tpu.vector_store %arg5[%c0_41, %c16, %c0_42], %16 {strides = array<i32>} : memref<1x36x16xf32, #tpu.memory_space<vmem>>, vector<1x4x16xf32>,
    %c0_43 = arith.constant 0 : index
    %c0_44 = arith.constant 0 : index
    %c1_45 = arith.constant 1 : index
    %18 = vector.load %arg1[%c0_43, %c0_44, %c1_45] : memref<1x4x16xf32, #tpu.memory_space<vmem>>, vector<1x4x15xf32>
    %c0_46 = arith.constant 0 : index
    %c20 = arith.constant 20 : index
    %c0_47 = arith.constant 0 : index
    %19 = vector.load %arg5[%c0_46, %c20, %c0_47] : memref<1x36x16xf32, #tpu.memory_space<vmem>>, vector<1x4x15xf32>
    tpu.vector_store %arg5[%c0_46, %c20, %c0_47], %18 {strides = array<i32>} : memref<1x36x16xf32, #tpu.memory_space<vmem>>, vector<1x4x15xf32>,
    %c0_48 = arith.constant 0 : index
    %c0_49 = arith.constant 0 : index
    %c0_50 = arith.constant 0 : index
    %20 = vector.load %arg1[%c0_48, %c0_49, %c0_50] : memref<1x4x16xf32, #tpu.memory_space<vmem>>, vector<1x4x1xf32>
    %c0_51 = arith.constant 0 : index
    %c20_52 = arith.constant 20 : index
    %c15_53 = arith.constant 15 : index
    %21 = vector.load %arg5[%c0_51, %c20_52, %c15_53] : memref<1x36x16xf32, #tpu.memory_space<vmem>>, vector<1x4x1xf32>
    tpu.vector_store %arg5[%c0_51, %c20_52, %c15_53], %20 {strides = array<i32>} : memref<1x36x16xf32, #tpu.memory_space<vmem>>, vector<1x4x1xf32>,
    %c0_54 = arith.constant 0 : index
    %c0_55 = arith.constant 0 : index
    %c2_56 = arith.constant 2 : index
    %22 = vector.load %arg1[%c0_54, %c0_55, %c2_56] : memref<1x4x16xf32, #tpu.memory_space<vmem>>, vector<1x4x14xf32>
    %c0_57 = arith.constant 0 : index
    %c24 = arith.constant 24 : index
    %c0_58 = arith.constant 0 : index
    %23 = vector.load %arg5[%c0_57, %c24, %c0_58] : memref<1x36x16xf32, #tpu.memory_space<vmem>>, vector<1x4x14xf32>
    tpu.vector_store %arg5[%c0_57, %c24, %c0_58], %22 {strides = array<i32>} : memref<1x36x16xf32, #tpu.memory_space<vmem>>, vector<1x4x14xf32>,
    %c0_59 = arith.constant 0 : index
    %c0_60 = arith.constant 0 : index
    %c0_61 = arith.constant 0 : index
    %24 = vector.load %arg1[%c0_59, %c0_60, %c0_61] : memref<1x4x16xf32, #tpu.memory_space<vmem>>, vector<1x4x2xf32>
    %c0_62 = arith.constant 0 : index
    %c24_63 = arith.constant 24 : index
    %c14_64 = arith.constant 14 : index
    %25 = vector.load %arg5[%c0_62, %c24_63, %c14_64] : memref<1x36x16xf32, #tpu.memory_space<vmem>>, vector<1x4x2xf32>
    tpu.vector_store %arg5[%c0_62, %c24_63, %c14_64], %24 {strides = array<i32>} : memref<1x36x16xf32, #tpu.memory_space<vmem>>, vector<1x4x2xf32>,
    %c0_65 = arith.constant 0 : index
    %c0_66 = arith.constant 0 : index
    %c3_67 = arith.constant 3 : index
    %26 = vector.load %arg1[%c0_65, %c0_66, %c3_67] : memref<1x4x16xf32, #tpu.memory_space<vmem>>, vector<1x4x13xf32>
    %c0_68 = arith.constant 0 : index
    %c28 = arith.constant 28 : index
    %c0_69 = arith.constant 0 : index
    %27 = vector.load %arg5[%c0_68, %c28, %c0_69] : memref<1x36x16xf32, #tpu.memory_space<vmem>>, vector<1x4x13xf32>
    tpu.vector_store %arg5[%c0_68, %c28, %c0_69], %26 {strides = array<i32>} : memref<1x36x16xf32, #tpu.memory_space<vmem>>, vector<1x4x13xf32>,
    %c0_70 = arith.constant 0 : index
    %c0_71 = arith.constant 0 : index
    %c0_72 = arith.constant 0 : index
    %28 = vector.load %arg1[%c0_70, %c0_71, %c0_72] : memref<1x4x16xf32, #tpu.memory_space<vmem>>, vector<1x4x3xf32>
    %c0_73 = arith.constant 0 : index
    %c28_74 = arith.constant 28 : index
    %c13_75 = arith.constant 13 : index
    %29 = vector.load %arg5[%c0_73, %c28_74, %c13_75] : memref<1x36x16xf32, #tpu.memory_space<vmem>>, vector<1x4x3xf32>
    tpu.vector_store %arg5[%c0_73, %c28_74, %c13_75], %28 {strides = array<i32>} : memref<1x36x16xf32, #tpu.memory_space<vmem>>, vector<1x4x3xf32>,
    %c0_76 = arith.constant 0 : index
    %c0_77 = arith.constant 0 : index
    %c4_78 = arith.constant 4 : index
    %30 = vector.load %arg1[%c0_76, %c0_77, %c4_78] : memref<1x4x16xf32, #tpu.memory_space<vmem>>, vector<1x4x12xf32>
    %c0_79 = arith.constant 0 : index
    %c32 = arith.constant 32 : index
    %c0_80 = arith.constant 0 : index
    %31 = vector.load %arg5[%c0_79, %c32, %c0_80] : memref<1x36x16xf32, #tpu.memory_space<vmem>>, vector<1x4x12xf32>
    tpu.vector_store %arg5[%c0_79, %c32, %c0_80], %30 {strides = array<i32>} : memref<1x36x16xf32, #tpu.memory_space<vmem>>, vector<1x4x12xf32>,
    %c0_81 = arith.constant 0 : index
    %c0_82 = arith.constant 0 : index
    %c0_83 = arith.constant 0 : index
    %32 = vector.load %arg1[%c0_81, %c0_82, %c0_83] : memref<1x4x16xf32, #tpu.memory_space<vmem>>, vector<1x4x4xf32>
    %c0_84 = arith.constant 0 : index
    %c32_85 = arith.constant 32 : index
    %c12_86 = arith.constant 12 : index
    %33 = vector.load %arg5[%c0_84, %c32_85, %c12_86] : memref<1x36x16xf32, #tpu.memory_space<vmem>>, vector<1x4x4xf32>
    tpu.vector_store %arg5[%c0_84, %c32_85, %c12_86], %32 {strides = array<i32>} : memref<1x36x16xf32, #tpu.memory_space<vmem>>, vector<1x4x4xf32>,
    %c0_87 = arith.constant 0 : index
    %c0_88 = arith.constant 0 : index
    %34 = vector.load %arg3[%c0_87, %c0_88] : memref<4x1xf32, #tpu.memory_space<vmem>>, vector<4x1xf32>
    %c0_89 = arith.constant 0 : index
    %c0_90 = arith.constant 0 : index
    %35 = vector.load %arg2[%c0_89, %c0_90] : memref<8x36xf32, #tpu.memory_space<vmem>>, vector<8x36xf32>
    %c0_91 = arith.constant 0 : index
    %c0_92 = arith.constant 0 : index
    %c0_93 = arith.constant 0 : index
    %36 = vector.load %arg5[%c0_91, %c0_92, %c0_93] : memref<1x36x16xf32, #tpu.memory_space<vmem>>, vector<1x36x16xf32>
    %37 = vector.shape_cast %36 : vector<1x36x16xf32> to vector<36x16xf32>
    %cst = arith.constant dense<0.000000e+00> : vector<8x16xf32>
    %38 = tpu.matmul %35, %37, %cst {dimension_numbers = #tpu.dot_dimension_numbers<[1], [0], [0], [1], [0, 0, 1, 1], [], []>} : vector<8x36xf32>, vector<36x16xf32>, vector<8x16xf32> -> vector<8x16xf32>
    %39 = vector.extract_strided_slice %38 {offsets = [0, 0], sizes = [4, 16], strides = [1, 1]} : vector<8x16xf32> to vector<4x16xf32>
    %40 = vector.broadcast %34 : vector<4x1xf32> to vector<4x16xf32>
    %41 = arith.addf %39, %40 : vector<4x16xf32>
    %c0_94 = arith.constant 0 : index
    %c0_95 = arith.constant 0 : index
    %c0_96 = arith.constant 0 : index
    %42 = vector.load %arg4[%c0_94, %c0_95, %c0_96] : memref<1x4x16xf32, #tpu.memory_space<vmem>>, vector<1x4x16xf32>
    %43 = vector.shape_cast %42 : vector<1x4x16xf32> to vector<4x16xf32>
    %44 = vector.shape_cast %41 : vector<4x16xf32> to vector<1x4x16xf32>
    tpu.vector_store %arg4[%c0_94, %c0_95, %c0_96], %44 {strides = array<i32>} : memref<1x4x16xf32, #tpu.memory_space<vmem>>, vector<1x4x16xf32>,
    return
  }
  func.func @transform_0(%arg0: i32) -> (i32, i32, i32) {
    %c0_i32 = arith.constant 0 : i32
    %c0_i32_0 = arith.constant 0 : i32
    %c0_i32_1 = arith.constant 0 : i32
    return %arg0, %c0_i32, %c0_i32_0 : i32, i32, i32
  }
  func.func @transform_1(%arg0: i32) -> (i32, i32) {
    %c0_i32 = arith.constant 0 : i32
    %c0_i32_0 = arith.constant 0 : i32
    %c0_i32_1 = arith.constant 0 : i32
    return %c0_i32, %c0_i32_0 : i32, i32
  }
  func.func @transform_2(%arg0: i32) -> (i32, i32) {
    %c0_i32 = arith.constant 0 : i32
    %c0_i32_0 = arith.constant 0 : i32
    %c0_i32_1 = arith.constant 0 : i32
    return %c0_i32, %c0_i32_0 : i32, i32
  }
  func.func @transform_3(%arg0: i32) -> (i32, i32, i32) {
    %c0_i32 = arith.constant 0 : i32
    %c0_i32_0 = arith.constant 0 : i32
    %c0_i32_1 = arith.constant 0 : i32
    return %arg0, %c0_i32, %c0_i32_0 : i32, i32, i32
  }
}

</mosaic_0001>

<bundles_post_ra>
// kernel: tpu_custom_call.1
= control target key start
LH: loop header
LB: loop body
LE: loop exit
PB: predicated region body
PF: predicated region fallthrough
CT: control target
= control target key end

     0   :  { %8 = vsyncpa [#allocation4], 0  ;;  %s919_s0 = inlined_call_operand.hbm [shape: f32[2,4,16], index: 0, kind: input, shape index: {}]   ;;  %s920_s1 = inlined_call_operand.vmem [shape: f32[8,36], index: 1, kind: input, shape index: {}]   ;;  %s921_s2 = inlined_call_operand.vmem [shape: f32[4,1], index: 2, kind: input, shape index: {}]   ;;  %s922_s3 = inlined_call_operand.hbm [shape: f32[2,4,16], index: 3, kind: output, shape index: {}]  }
   0x1   :  { %10 = vsyncpa [#allocation4 + $0x1], 0 }
   0x2   :  { %11 = vsyncpa [#allocation5], 0 }
   0x3   :  { %13 = vsyncpa [#allocation5 + $0x1], 0  ;;  %s723_s12 = smov 0   ;;  %s725_s13 = smov 0  }
   0x4   :  { %s727_s14 = smov 0   ;;  %s729_s15 = smov 0  }
   0x5 LB: > { %s744_s16 = sadd.s32 4294967295, %s679_s15   ;;  %s477_s17 = sadd.s32 4294967294, %s679_s15   ;;  %s679_s15 = sphi %s729_s15, %s937_s15   ;;  %s675_s14 = sphi %s727_s14, %s936_s14   ;;  %s671_s13 = sphi %s725_s13, %s935_s13   ;;  %s667_s12 = sphi %s723_s12, %s934_s12  }
   0x6   : > { %s748_s18 = sadd.s32 1, %s679_s15   ;;  %s26_s19 = sadd.s32 1, %s675_s14 }
   0x7   : > { %s23_s20 = ssub.s32 %s679_s15, %s748_s18  ;;  %p33_p0 = scmp.ne.s32.totalorder %s675_s14, %s671_s13 }
   0x8   : > { %p24_p1 = scmp.eq.s32.totalorder %s23_s20, 0  ;;  %p34_p2 = scmp.eq.s32.totalorder %s679_s15, 0 }
   0x9   : > { %p39_p3 = scmp.ne.s32.totalorder %s671_s13, %s667_s12  ;;  %p40_p4 = scmp.eq.s32.totalorder %s744_s16, 0 }
   0xa   : > { %s760_s21 = scalar_select %p24_p1, %s675_s14, %s26_s19  }
   0xb   : > { %p762_p5 = por %p34_p2, %p33_p0  ;;  %p766_p6 = por %p40_p4, %p39_p3 }
   0xc   : > { %p105_p7 = scmp.eq.s32.totalorder %s744_s16, 1  ;;  %p111_p8 = scmp.eq.s32.totalorder %s477_s17, 1 }
   0xd   : > { %p528_p10 = scmp.lt.s32.totalorder %s679_s15, 2  ;;  %s137_s26 = sand.u32 1, %s675_s14  }
   0xe   : > { %p773_p11 = por %p105_p7, %p33_p0  ;;  %p777_p12 = por %p111_p8, %p39_p3 }
   0xf   : > { %s481_s27 = sshll.u32 %s679_s15, 6  ;;  %s480_s28 = sshll.u32 %s137_s26, 2 }
  0x10   : > { %s926_s24 = scalar_select %p773_p11, 1, 0 }
  0x11   : > { %s927_s25 = scalar_select %p777_p12, 1, 0 }
  0x12   : > { %s786_s4 = scalar_lea.hbm %s919_s0, %s481_s27  ;;  %s141_s5 = scalar_lea.vmem [#allocation3], %s480_s28 }
  0x13   : > { %s148_s6 = sshll.u32 %s141_s5, 4  ;;  %p790_p13 = pnand %p528_p10, %p762_p5  ;;  %s794_s6 = int_to_ptr.vmem [resolvable:$true] %s148_s6 }
  0x14   : > { %s138_s8 = scalar_lea.sflag [#allocation4], %s137_s26  ;;  %s583_s9 = scalar_lea.hbm %s786_s4, 64 }
  0x15   : > { %p584_p2 = scmp.ne.s32.totalorder %s786_s4, %s583_s9  ;;  %p585_p3 = pneg %p790_p13 }
  0x16   : > { %s588_s17 = scalar_lea.hbm %s919_s0, 128  ;;  %p589_p5 = scmp.lt.u32.totalorder %s786_s4, %s919_s0 }
  0x17   : > { %p586_p4 = pnand %p585_p3, %p584_p2  ;;  %p590_p8 = scmp.lt.u32.totalorder %s588_s17, %s583_s9 }
  0x18   : > { %p592_p9 = scmp.lt.u32.totalorder %s583_s9, %s786_s4 }
  0x19   : > { %p587_p7 = pneg %p586_p4  ;;  %p591_p10 = por %p590_p8, %p589_p5 }
  0x1b   : > { %p593_p0 = por %p592_p9, %p591_p10 }
  0x1d   : > { %p594_p1 = pnand %p593_p0, %p587_p7 }
  0x1f   : > { %597 = shalt.err (!%p594_p1)
}
  0x20   : > { %s598_s22 = scalar_lea.vmem %s794_s6, 64  ;;  %s681_s26 = smov [#allocation3]  }
  0x21   : > { %p599_p2 = scmp.ne.s32.totalorder %s794_s6, %s598_s22  ;;  %s603_s27 = sshll.u32 %s681_s26, 4  ;;  %s604_s27 = int_to_ptr.vmem [resolvable:$false] %s603_s27 }
  0x22   : > { %s605_s28 = scalar_lea.vmem %s604_s27, 128  ;;  %p606_p11 = scmp.lt.s32.totalorder %s794_s6, %s604_s27 }
  0x23   : > { %p601_p4 = pnand %p599_p2, %p585_p3  ;;  %p607_p5 = scmp.lt.s32.totalorder %s605_s28, %s598_s22 }
  0x25   : > { %p602_p12 = pneg %p601_p4  ;;  %p608_p8 = por %p607_p5, %p606_p11 }
  0x27   : > { %p609_p9 = pnand %p608_p8, %p602_p12 }
  0x29   : > { %612 = shalt.err (!%p609_p9)
}
  0x2a   : > { %523 = dma.hbm_to_vmem [thread:$0]  (!%p790_p13), %s786_s4, 64, %s794_s6, %s138_s8  }
  0x2b   : > { %p929_p0 = scmp.lt.s32.totalorder %s679_s15, 3  ;;  %p930_p1 = scmp.ge.s32.totalorder %s679_s15, 1 }
  0x2d   : > { %p154_p3 = pnand %p930_p1, %p929_p0 }
  0x2e   : > { %s828_s29 = sand.u32 (!%p154_p3), 1, %s671_s13  }
  0x2f   : > { %157 = sbr.rel (%p154_p3) target bundleno = 439 (0x1b7), region = 32  ;;  %s483_s30 = sshll.u32 (!%p154_p3), %s828_s29, 2 }
  0x30   : > { %s160_s5 = scalar_lea.sflag (!%p154_p3), [#allocation4], %s828_s29  ;;  %s834_s7 = scalar_lea.vmem (!%p154_p3), [#allocation3], %s483_s30 }
  0x36   : > { %658 = dma.done.wait (%p766_p6), %s160_s5, 64  }
  0x37   : > { %660 = vsyncadd (%p766_p6), %s160_s5, 4294967232  ;;  %v214_v0 = vld [vmem:[%s834_s7] sm:$0xf]  ;;  %s682_s4 = smov 114   ;;  %s683_s6 = smov 116   ;;  %vm243_vm0 = vcmask 125952  }
  0x38   : > { %v186_v1 = vld [vmem:[%s834_s7] sm:$0xf]  ;;  %216 = vrot.lane.b32.xlu1 %v214_v0, %s682_s4  ;;  %s684_s8 = smov 113   ;;  %s685_s23 = smov 115   ;;  %v688_v9 = vmov 0.0|0.0   ;;  %vm697_vm1 = vmmov 0  }
  0x39   : > { %188 = vrot.lane.b32.xlu0 %v186_v1, %s683_s6  ;;  %v228_v2 = vld [vmem:[%s834_s7] sm:$0xf]  ;;  %s686_s9 = smov 3   ;;  %s687_s10 = smov 4   ;;  %510 = vmatprep.subr.bf16.mxu0 %v688_v9  ;;  %v698_v18 = vmov 0.0   ;;  %v699_v19 = vmov 0  }
  0x3a   : > { %v200_v3 = vld [vmem:[%s834_s7] sm:$0xf]  ;;  %s689_s11 = smov 1   ;;  %s690_s17 = smov 2   ;;  %507 = vmatprep.mubr.msk.f32.mxu0 %vm697_vm1, %v698_v18  ;;  %582 = vset.pattern.permute.xlu0 %v699_v19  ;;  %v301_v20 = vld [vmem:[%s921_s2] sm:$0xf] }
  0x3b   : > { %v207_v4 = vld [vmem:[%s834_s7] sm:$0xf]  ;;  %s691_s19 = smov 126   ;;  %s692_s20 = smov 127   ;;  %vm219_vm2 = vcmask 11264   ;;  %vm191_vm3 = vcmask 27648  }
  0x3c   : > { %230 = vrot.lane.b32.xlu1 %v228_v2, %s684_s8  ;;  %v193_v5 = vld [vmem:[%s834_s7] sm:$0xf]  ;;  %s693_s22 = smov 15   ;;  %s694_s26 = smov 125   ;;  %vm233_vm4 = vcmask 3072   ;;  %vm205_vm5 = vcmask 19456  }
  0x3d   : > { %202 = vrot.lane.b32.xlu0 %v200_v3, %s685_s23  ;;  %v242_v6 = vld [vmem:[%s834_s7] sm:$0xf]  ;;  %s695_s27 = smov 13   ;;  %s696_s28 = smov 14   ;;  %vm212_vm6 = vcmask 125976   ;;  %vm198_vm7 = vcmask 125984  }
  0x3e   : > { %244 = vst.msk [vmem:[#allocation2 + $0x10] sm:$0xf] %vm243_vm0, %v242_v6  ;;  %v235_v7 = vld [vmem:[%s834_s7] sm:$0xf]  ;;  %s700_s5 = smov 124   ;;  %s701_s4 = smov 12  }
  0x3f   : > { %v221_v8 = vld [vmem:[%s834_s7] sm:$0xf]  ;;  %vm240_vm8 = vcmask 125960   ;;  %vm226_vm9 = vcmask 125968   ;;  %vm264_vm10 = vcmask 109568   ;;  %vm250_vm11 = vcmask 117760  }
  0x40   : > { %209 = vrot.lane.b32.xlu1 %v207_v4, %s686_s9  ;;  %v259_v10 = vld [vmem:[%s834_s7] sm:$0xf]  ;;  %vm257_vm12 = vcmask 126072   ;;  %vm278_vm13 = vcmask 101376   ;;  %vm285_vm14 = vcmask 126056   ;;  %vm271_vm15 = vcmask 126064  }
  0x41   : > { %195 = vrot.lane.b32.xlu0 %v193_v5, %s687_s10  ;;  %v245_v11 = vld [vmem:[%s834_s7] sm:$0xf]  ;;  %vm292_vm1 = vcmask 93184   ;;  %v302_v44 = vld [vmem:[%s920_s1] sm:$0xff]  ;;  %s488_s9 = sshll.u32 %s744_s16, 6  ;;  %s185_s10 = scalar_lea.vmem [#allocation6], %s483_s30 }
  0x42   : > { %v252_v12 = vld [vmem:[%s834_s7] sm:$0xf]  ;;  %p931_p11 = scmp.ne.s32.totalorder %s926_s24, 0  ;;  %s702_s30 = smov [#allocation6]  }
  0x43   : > { %v273_v13 = vld [vmem:[%s834_s7] sm:$0xf] }
  0x44   : > { %237 = vrot.lane.b32.xlu1 %v235_v7, %s689_s11  ;;  %v280_v14 = vld [vmem:[%s834_s7] sm:$0xf]  ;;  %s407_s11 = sshll.u32 %s185_s10, 4  ;;  %s876_s11 = int_to_ptr.vmem [resolvable:$true] %s407_s11 }
  0x45   : > { %223 = vrot.lane.b32.xlu0 %v221_v8, %s690_s17  ;;  %v266_v15 = vld [vmem:[%s834_s7] sm:$0xf]  ;;  %s613_s16 = scalar_lea.vmem %s876_s11, 64 }
  0x46   : > { %v287_v16 = vld [vmem:[%s834_s7] sm:$0xf]  ;;  %p614_p6 = scmp.ne.s32.totalorder %s876_s11, %s613_s16 }
  0x47   : > { %v294_v17 = vld [vmem:[%s834_s7] sm:$0xf] }
  0x48   : > { %261 = vrot.lane.b32.xlu1 %v259_v10, %s691_s19  ;;  %p615_p12 = pnand %p614_p6, %p931_p11 }
  0x49   : > { %247 = vrot.lane.b32.xlu0 %v245_v11, %s692_s20  ;;  %s874_s20 = scalar_lea.hbm %s922_s3, %s488_s9 }
  0x4a   : > { %p616_p13 = pneg %p615_p12 }
  0x4c   : > { %254 = vrot.lane.b32.xlu1 %v252_v12, %s693_s22  ;;  %s394_s22 = scalar_lea.sflag [#allocation5], %s828_s29 }
  0x4d   : > { %275 = vrot.lane.b32.xlu0 %v273_v13, %s694_s26  ;;  %s617_s26 = sshll.u32 %s702_s30, 4  ;;  %s618_s26 = int_to_ptr.vmem [resolvable:$false] %s617_s26 }
  0x4e   : > { %p620_p7 = scmp.lt.s32.totalorder %s876_s11, %s618_s26 }
  0x50   : > { %282 = vrot.lane.b32.xlu1 %v280_v14, %s695_s27  ;;  %s619_s27 = scalar_lea.vmem %s618_s26, 128 }
  0x51   : > { %268 = vrot.lane.b32.xlu0 %v266_v15, %s696_s28  ;;  %p621_p10 = scmp.lt.s32.totalorder %s619_s27, %s613_s16 }
  0x53   : > { %p622_p2 = por %p621_p10, %p620_p7 }
  0x54   : > { %296 = vrot.lane.b32.xlu1 %v294_v17, %s701_s4 }
  0x55   : > { %289 = vrot.lane.b32.xlu0 %v287_v16, %s700_s5  ;;  %p623_p4 = pnand %p622_p2, %p616_p13 }
  0x59   : > { %388 = vperm.xlu0 %582, %v301_v20  }
  0xaa   : > { %v217_v21 = vpop.permute.xlu1 %216 }
  0xab   : > { %v189_v22 = vpop.permute.xlu0 %188  ;;  %220 = vst.msk [vmem:[#allocation2 + $0x8] sm:$0xf] %vm219_vm2, %v217_v21  ;;  %vm299_vm2 = vcmask 126048  }
  0xac   : > { %192 = vst.msk [vmem:[#allocation2] sm:$0xf] %vm191_vm3, %v189_v22  ;;  %vm312_vm3 = vcmask 1043456  }
  0xae   : > { %v231_v23 = vpop.permute.xlu1 %230 }
  0xaf   : > { %v203_v24 = vpop.permute.xlu0 %202  ;;  %234 = vst.msk [vmem:[#allocation2 + $0xc] sm:$0xf] %vm233_vm4, %v231_v23  ;;  %vm308_vm4 = vcmask 293888  }
  0xb0   : > { %206 = vst.msk [vmem:[#allocation2 + $0x4] sm:$0xf] %vm205_vm5, %v203_v24 }
  0xb2   : > { %v210_v25 = vpop.permute.xlu1 %209 }
  0xb3   : > { %v196_v26 = vpop.permute.xlu0 %195  ;;  %213 = vst.msk [vmem:[#allocation2 + $0x4] sm:$0xf] %vm212_vm6, %v210_v25 }
  0xb4   : > { %199 = vst.msk [vmem:[#allocation2] sm:$0xf] %vm198_vm7, %v196_v26 }
  0xb6   : > { %v238_v27 = vpop.permute.xlu1 %237 }
  0xb7   : > { %v224_v28 = vpop.permute.xlu0 %223  ;;  %241 = vst.msk [vmem:[#allocation2 + $0xc] sm:$0xf] %vm240_vm8, %v238_v27 }
  0xb8   : > { %227 = vst.msk [vmem:[#allocation2 + $0x8] sm:$0xf] %vm226_vm9, %v224_v28 }
  0xba   : > { %v262_v29 = vpop.permute.xlu1 %261 }
  0xbb   : > { %v248_v30 = vpop.permute.xlu0 %247  ;;  %265 = vst.msk [vmem:[#allocation2 + $0x18] sm:$0xf] %vm264_vm10, %v262_v29  ;;  %v303_v33 = vld [vmem:[#allocation2] sm:$0xff] }
  0xbc   : > { %251 = vst.msk [vmem:[#allocation2 + $0x14] sm:$0xf] %vm250_vm11, %v248_v30 }
  0xbe   : > { %v255_v31 = vpop.permute.xlu1 %254 }
  0xbf   : > { %v276_v32 = vpop.permute.xlu0 %275  ;;  %v304_v34 = vld [vmem:[#allocation2 + $0x8] sm:$0xff]  ;;  %258 = vst.msk [vmem:[#allocation2 + $0x14] sm:$0xf] %vm257_vm12, %v255_v31 }
  0xc0   : > { %279 = vst.msk [vmem:[#allocation2 + $0x1c] sm:$0xf] %vm278_vm13, %v276_v32  ;;  %v511_v35 = vpack.c.bf16 %v304_v34, %v303_v33 }
  0xc2   : > { %512 = vmatpush3.bf16.msra.mxu0 %v511_v35  ;;  %v283_v36 = vpop.permute.xlu1 %282 }
  0xc3   : > { %v269_v37 = vpop.permute.xlu0 %268  ;;  %513 = vmatprep.subr.bf16.mxu0 %v688_v9  ;;  %286 = vst.msk [vmem:[#allocation2 + $0x1c] sm:$0xf] %vm285_vm14, %v283_v36 }
  0xc4   : > { %272 = vst.msk [vmem:[#allocation2 + $0x18] sm:$0xf] %vm271_vm15, %v269_v37 }
  0xc6   : > { %v297_v39 = vpop.permute.xlu1 %296  ;;  %v305_v40 = vld [vmem:[#allocation2 + $0x10] sm:$0xff] }
  0xc7   : > { %v290_v38 = vpop.permute.xlu0 %289 }
  0xc8   : > { %293 = vst.msk [vmem:[#allocation2 + $0x20] sm:$0xf] %vm292_vm1, %v290_v38 }
  0xc9   : > { %300 = vst.msk [vmem:[#allocation2 + $0x20] sm:$0xf] %vm299_vm2, %v297_v39 }
  0xcb   : > { %v306_v41 = vld [vmem:[#allocation2 + $0x18] sm:$0xff] }
  0xcc   : > { %v514_v42 = vpack.c.bf16 %v306_v41, %v305_v40 }
  0xce   : > { %515 = vmatpush3.bf16.msra.mxu0 %v514_v42 }
  0xcf   : > { %505 = vmatprep.subr.mxu0 %v698_v18 }
  0xd0   : > { %v307_v43 = vld [vmem:[#allocation2 + $0x20] sm:$0xf] }
  0xd2   : > { %506 = vmatpush3.msk.msra.mxu0 %vm312_vm3, %v307_v43 }
  0xd3   : > { %508 = vmatmul.mubr.msk.f32.vlgmr.msra.gmra.mrb[0].mxu0 %vm308_vm4, %v302_v44 }
  0xd8   : > { %v389_v45 = vpop.permute.xlu0 %388 }
 0x1a6   : > { %v382_v46 = vpop.f32.mrb[0].mxu0 }
 0x1a7   : > { %v391_v47 = vadd.f32 %v389_v45, %v382_v46  ;;  %v509_v48 = vpop.f32.mrb[1].mxu0 }
 0x1a9   : > { %392 = vst.msk [vmem:[%s185_s10] sm:$0xf] %vm243_vm0, %v391_v47 }
 0x1aa   : > { %626 = shalt.err (!%p623_p4)
}
 0x1ab   : > { %s627_s29 = scalar_lea.hbm %s874_s20, 64  ;;  %s631_s4 = scalar_lea.hbm %s922_s3, 128 }
 0x1ac   : > { %p628_p5 = scmp.ne.s32.totalorder %s874_s20, %s627_s29  ;;  %p632_p0 = scmp.lt.u32.totalorder %s874_s20, %s922_s3 }
 0x1ad   : > { %p633_p1 = scmp.lt.u32.totalorder %s631_s4, %s627_s29  ;;  %p635_p6 = scmp.lt.u32.totalorder %s627_s29, %s874_s20 }
 0x1ae   : > { %p629_p8 = pnand %p628_p5, %p931_p11 }
 0x1af   : > { %p634_p3 = por %p633_p1, %p632_p0 }
 0x1b0   : > { %p630_p9 = pneg %p629_p8 }
 0x1b1   : > { %p636_p12 = por %p635_p6, %p634_p3 }
 0x1b3   : > { %p637_p13 = pnand %p636_p12, %p630_p9 }
 0x1b5   : > { %640 = shalt.err (!%p637_p13)
}
 0x1b6   : > { %518 = dma.vmem_to_hbm [thread:$0]  (%p931_p11), %s876_s11, 64, %s874_s20, %s394_s22  }
 0x1b7 PF: > { %s419_s7 = sand.u32 1, %s667_s12   ;;  %p932_p7 = scmp.ne.s32.totalorder %s927_s25, 0 }
 0x1b8   : > { %p933_p10 = scmp.ge.s32.totalorder %s679_s15, 2  ;;  %s420_s23 = scalar_lea.sflag [#allocation5], %s419_s7 }
 0x1ba   : > { %p525_p2 = pnand %p933_p10, %p932_p7 }
 0x1bc   : > { %662 = dma.done.wait (!%p525_p2), %s420_s23, 64  }
 0x1bd   : > { %664 = vsyncadd (!%p525_p2), %s420_s23, 4294967232  ;;  %p16_p4 = scmp.ge.s32.totalorder %s748_s18, 4   ;;  %s934_s12 = smov %s671_s13 }
 0x1be   : > { %s935_s13 = smov %s675_s14  ;;  %s936_s14 = smov %s760_s21 }
 0x1bf   : > { %s937_s15 = smov %s748_s18  ;;  %18 = sbr.rel (!%p16_p4) target bundleno = 5 (0x5), region = 77 }
 0x1c6   :  { %425 = vsyncpa [#allocation4], 1 }
 0x1c7   :  { %427 = vsyncpa [#allocation4 + $0x1], 1 }
 0x1c8   :  { %428 = vsyncpa [#allocation5], 1 }
 0x1c9   :  { %430 = vsyncpa [#allocation5 + $0x1], 1 }

</bundles_post_ra>
